<compile_context>
chip_gen: v7x
topology: tpu7x:2x2x1
jax: 0.10.0
libtpu: 0.0.40
codegen_flags: <defaults>
</compile_context>

<pallas_src>
import functools

import jax
import jax.numpy as jnp
from jax import lax
from jax.experimental import pallas as pl
from jax.experimental.pallas import tpu as pltpu

# Keep the pure-JAX reference at full f32 matmul precision so it matches the
# in-kernel f32 MXU path at tight tolerance.
jax.config.update("jax_default_matmul_precision", "highest")

# Explicit VMEM budget (review: do not inherit a v6e-tuned value; stay well under
# v7x's 64 MiB physical / 32 MiB scoped).
VMEM_LIMIT_BYTES = 24 * 1024 * 1024


def _fast_bf16_supported():
    """bf16 MXU inputs only pay off on v6e/v7x (review); keep f32 on v5 and older."""
    try:
        kind = jax.devices()[0].device_kind.lower()
    except Exception:
        return False
    return not any(tag in kind for tag in ("v2", "v3", "v4", "v5"))


def _batch_tile(batch):
    # Whole batch in one block while small (single grid step, no partial tiles);
    # 512-row tiles (multiple of 8 sublanes) once the batch is large enough for
    # double-buffered pipelining to matter.
    return batch if batch <= 512 else 512


def _compiler_params():
    return pltpu.CompilerParams(
        dimension_semantics=("parallel",),      # batch axis: megacore-shardable
        vmem_limit_bytes=VMEM_LIMIT_BYTES,
    )


def _row_spec(tb, dim):
    return pl.BlockSpec((tb, dim), lambda i: (i, 0))


def _const_spec(shape):
    nd = len(shape)
    return pl.BlockSpec(shape, lambda i: (0,) * nd)


def _sigmoid(x):
    # Explicit exp-based sigmoid so kernel and reference use identical math.
    return 1.0 / (1.0 + jnp.exp(-x))


def _lstm_cell(x_t, h, c, wih, whh, b, hidden, cdtype):
    gates = (jnp.dot(x_t.astype(cdtype), wih, preferred_element_type=jnp.float32)
             + jnp.dot(h.astype(cdtype), whh, preferred_element_type=jnp.float32)
             + b)
    i_g = _sigmoid(gates[:, 0 * hidden:1 * hidden])
    f_g = _sigmoid(gates[:, 1 * hidden:2 * hidden])
    g_g = jnp.tanh(gates[:, 2 * hidden:3 * hidden])
    o_g = _sigmoid(gates[:, 3 * hidden:4 * hidden])
    c_new = f_g * c + i_g * g_g
    h_new = o_g * jnp.tanh(c_new)
    return h_new, c_new


# --------------------------------------------------------------------------- #
# Kernel 1: encoder LSTM over the full (time-major) sequence -> final hidden.  #
# pack_padded_sequence semantics: state only updates while t < length.         #
# --------------------------------------------------------------------------- #
def _encoder_lstm_kernel(cdtype, x_ref, len_ref, wih_ref, whh_ref, b_ref, hn_ref):
    seq_len, tb, _ = x_ref.shape
    hidden = whh_ref.shape[0]
    wih = wih_ref[...].astype(cdtype)
    whh = whh_ref[...].astype(cdtype)
    b = b_ref[...]
    lens = len_ref[...]                                  # (tb, 1) int32

    def step(t, carry):
        h, c = carry
        h_new, c_new = _lstm_cell(x_ref[t], h, c, wih, whh, b, hidden, cdtype)
        valid = t < lens                                 # (tb, 1) bool
        return (jnp.where(valid, h_new, h), jnp.where(valid, c_new, c))

    h0 = jnp.zeros((tb, hidden), jnp.float32)
    c0 = jnp.zeros((tb, hidden), jnp.float32)
    h_fin, _ = lax.fori_loop(0, seq_len, step, (h0, c0))
    hn_ref[...] = h_fin


# --------------------------------------------------------------------------- #
# Kernel 2: all latent MLP heads fused (weights resident in VMEM).             #
# Concats are expressed as split-weight matmul sums (no in-kernel concat).     #
# --------------------------------------------------------------------------- #
def _latent_heads_kernel(cdtype, code_size,
                         h_ref, topics_ref, lab_ref, eps_ref,
                         wz1_ref, bz1_ref, wz2_ref, bz2_ref,
                         wp_h_ref, wp_t_ref, wp_l_ref, bp_ref,
                         wt1z_ref, wt1l_ref, bt1_ref, wt2_ref, bt2_ref,
                         wb1z_ref, wb1l_ref, bb1_ref, wb2_ref, bb2_ref,
                         wcz_ref, wct_ref, wcl_ref, bc_ref,
                         zpr_ref, polv_ref, z_ref, alphas_ref, bow_ref, dechc_ref):
    def mm(a, w_ref):
        return jnp.dot(a.astype(cdtype), w_ref[...].astype(cdtype),
                       preferred_element_type=jnp.float32)

    h = h_ref[...]
    topics = topics_ref[...]
    lab = lab_ref[...]
    eps = eps_ref[...]

    # ZPrior: MLP(label_embed -> hidden -> 2*code)  => [mu_pr | logvar_pr]
    hz = jnp.maximum(mm(lab, wz1_ref) + bz1_ref[...], 0.0)
    zpr_ref[...] = mm(hz, wz2_ref) + bz2_ref[...]

    # Posterior: fcmu|fclogvar fused on [h, topics, lab_emb]
    polv = mm(h, wp_h_ref) + mm(topics, wp_t_ref) + mm(lab, wp_l_ref) + bp_ref[...]
    polv_ref[...] = polv
    mu_po = polv[:, :code_size]
    logvar_po = polv[:, code_size:]

    # reparameterize (eps == 0 -> eval path z = mu_po)
    z = mu_po + jnp.exp(0.5 * logvar_po) * eps
    z_ref[...] = z

    # TopicPrior: exp(MLP([z, lab_emb]))  (exp runs on the EUP slot)
    ht = jnp.maximum(mm(z, wt1z_ref) + mm(lab, wt1l_ref) + bt1_ref[...], 0.0)
    alphas_ref[...] = jnp.exp(mm(ht, wt2_ref) + bt2_ref[...])

    # BowPredictor: MLP([z, lab_emb])
    hb = jnp.maximum(mm(z, wb1z_ref) + mm(lab, wb1l_ref) + bb1_ref[...], 0.0)
    bow_ref[...] = mm(hb, wb2_ref) + bb2_ref[...]

    # Decoder init hidden: tanh(fccode([z, topics, lab_emb])) = [h0 | c0]
    dechc_ref[...] = jnp.tanh(mm(z, wcz_ref) + mm(topics, wct_ref)
                              + mm(lab, wcl_ref) + bc_ref[...])


# --------------------------------------------------------------------------- #
# Kernel 3: decoder LSTM + fcout over the full sequence (outputs zero-padded   #
# past each sequence length, matching pad_packed_sequence, then projected).    #
# --------------------------------------------------------------------------- #
def _decoder_lstm_kernel(cdtype, x_ref, len_ref, h0_ref, c0_ref,
                         wih_ref, whh_ref, b_ref, wout_ref, bout_ref, o_ref):
    seq_len, tb, _ = x_ref.shape
    hidden = whh_ref.shape[0]
    wih = wih_ref[...].astype(cdtype)
    whh = whh_ref[...].astype(cdtype)
    b = b_ref[...]
    wout = wout_ref[...].astype(cdtype)
    bout = bout_ref[...]
    lens = len_ref[...]

    def step(t, carry):
        h, c = carry
        h_new, c_new = _lstm_cell(x_ref[t], h, c, wih, whh, b, hidden, cdtype)
        valid = t < lens
        out_t = jnp.where(valid, h_new, 0.0)             # pad_packed zero-fill
        logits_t = jnp.dot(out_t.astype(cdtype), wout,
                           preferred_element_type=jnp.float32) + bout
        o_ref[t] = logits_t.astype(o_ref.dtype)
        return (jnp.where(valid, h_new, h), jnp.where(valid, c_new, c))

    lax.fori_loop(0, seq_len, step, (h0_ref[...], c0_ref[...]))


# --------------------------------------------------------------------------- #
# pallas_call wrappers                                                          #
# --------------------------------------------------------------------------- #
def encoder_lstm(x_tm, lens_col, wih, whh, b, *, use_bf16):
    seq_len, batch, embed = x_tm.shape
    hidden = whh.shape[0]
    tb = _batch_tile(batch)
    cdtype = jnp.bfloat16 if use_bf16 else jnp.float32
    return pl.pallas_call(
        functools.partial(_encoder_lstm_kernel, cdtype),
        out_shape=jax.ShapeDtypeStruct((batch, hidden), jnp.float32),
        grid=(pl.cdiv(batch, tb),),
        in_specs=[
            pl.BlockSpec((seq_len, tb, embed), lambda i: (0, i, 0)),
            _row_spec(tb, 1),
            _const_spec(wih.shape),
            _const_spec(whh.shape),
            _const_spec(b.shape),
        ],
        out_specs=_row_spec(tb, hidden),
        compiler_params=_compiler_params(),
    )(x_tm, lens_col, wih, whh, b)


def latent_heads(h_n, topics, lab, eps, p, *, use_bf16):
    batch, hidden = h_n.shape
    code = eps.shape[1]
    num_topics = topics.shape[1]
    label_dim = lab.shape[1]
    vocab = p["bow_w2"].shape[1]
    hidden2 = p["dec_wc_z"].shape[1]
    tb = _batch_tile(batch)
    cdtype = jnp.bfloat16 if use_bf16 else jnp.float32

    weights = [
        p["zp_w1"], p["zp_b1"], p["zp_w2"], p["zp_b2"],
        p["po_w_h"], p["po_w_t"], p["po_w_l"], p["po_b"],
        p["tp_w1_z"], p["tp_w1_l"], p["tp_b1"], p["tp_w2"], p["tp_b2"],
        p["bow_w1_z"], p["bow_w1_l"], p["bow_b1"], p["bow_w2"], p["bow_b2"],
        p["dec_wc_z"], p["dec_wc_t"], p["dec_wc_l"], p["dec_bc"],
    ]
    in_specs = ([_row_spec(tb, hidden), _row_spec(tb, num_topics),
                 _row_spec(tb, label_dim), _row_spec(tb, code)]
                + [_const_spec(w.shape) for w in weights])
    out_shape = (
        jax.ShapeDtypeStruct((batch, 2 * code), jnp.float32),    # prior [mu|logvar]
        jax.ShapeDtypeStruct((batch, 2 * code), jnp.float32),    # post  [mu|logvar]
        jax.ShapeDtypeStruct((batch, code), jnp.float32),        # z
        jax.ShapeDtypeStruct((batch, num_topics), jnp.float32),  # alphas
        jax.ShapeDtypeStruct((batch, vocab), jnp.float32),       # bow logits
        jax.ShapeDtypeStruct((batch, hidden2), jnp.float32),     # decoder [h0|c0]
    )
    out_specs = (
        _row_spec(tb, 2 * code), _row_spec(tb, 2 * code), _row_spec(tb, code),
        _row_spec(tb, num_topics), _row_spec(tb, vocab), _row_spec(tb, hidden2),
    )
    return pl.pallas_call(
        functools.partial(_latent_heads_kernel, cdtype, code),
        out_shape=out_shape,
        grid=(pl.cdiv(batch, tb),),
        in_specs=in_specs,
        out_specs=out_specs,
        compiler_params=_compiler_params(),
    )(h_n, topics, lab, eps, *weights)


def decoder_lstm(x_tm, lens_col, h0, c0, wih, whh, b, wout, bout, *, use_bf16):
    seq_len, batch, embed = x_tm.shape
    hidden = whh.shape[0]
    vocab = wout.shape[1]
    tb = _batch_tile(batch)
    cdtype = jnp.bfloat16 if use_bf16 else jnp.float32
    return pl.pallas_call(
        functools.partial(_decoder_lstm_kernel, cdtype),
        out_shape=jax.ShapeDtypeStruct((seq_len, batch, vocab), jnp.float32),
        grid=(pl.cdiv(batch, tb),),
        in_specs=[
            pl.BlockSpec((seq_len, tb, embed), lambda i: (0, i, 0)),
            _row_spec(tb, 1),
            _row_spec(tb, hidden),
            _row_spec(tb, hidden),
            _const_spec(wih.shape),
            _const_spec(whh.shape),
            _const_spec(b.shape),
            _const_spec(wout.shape),
            _const_spec(bout.shape),
        ],
        out_specs=pl.BlockSpec((seq_len, tb, vocab), lambda i: (0, i, 0)),
        compiler_params=_compiler_params(),
    )(x_tm, lens_col, h0, c0, wih, whh, b, wout, bout)


# --------------------------------------------------------------------------- #
# Full forward (mirrors TextCVAE.forward with joint=True, sample_topics=False) #
# --------------------------------------------------------------------------- #
def textcvae_forward(params, token_ids, labels, topics, lengths, eps=None,
                     use_bf16=None):
    batch, _ = token_ids.shape
    code = params["po_w_h"].shape[1] // 2
    hidden = params["enc_whh"].shape[0]
    if use_bf16 is None:
        # Review: bf16 MXU inputs only on the large-batch path, and only v6e/v7x.
        use_bf16 = (batch >= 256) and _fast_bf16_supported()
    if eps is None:
        eps = jnp.zeros((batch, code), jnp.float32)      # eval: z = mu_po

    # TODO(synk): nn.Embedding gather kept as an XLA jnp.take (tiny tables);
    # TODO(synk): training-mode dropout is not applied (eval semantics, p ignored).
    emb = jnp.take(params["embed"], token_ids, axis=0)          # (B, T, E)
    lab = jnp.take(params["label_embed"], labels, axis=0)       # (B, L)
    x_tm = jnp.transpose(emb, (1, 0, 2))                        # time-major (T, B, E)
    lens_col = lengths.astype(jnp.int32).reshape(batch, 1)

    # (1) encoder LSTM -> h_n
    h_n = encoder_lstm(x_tm, lens_col, params["enc_wih"], params["enc_whh"],
                       params["enc_b"], use_bf16=use_bf16)

    # (2) fused latent heads
    zpr, polv, _z, alphas, bow, dechc = latent_heads(
        h_n, topics, lab, eps, params, use_bf16=use_bf16)
    mu_pr, logvar_pr = zpr[:, :code], zpr[:, code:]
    mu_po, logvar_po = polv[:, :code], polv[:, code:]
    dec_h0, dec_c0 = dechc[:, :hidden], dechc[:, hidden:]

    # (3) decoder LSTM + fcout
    logits_tm = decoder_lstm(x_tm, lens_col, dec_h0, dec_c0,
                             params["dec_wih"], params["dec_whh"], params["dec_b"],
                             params["out_w"], params["out_b"], use_bf16=use_bf16)
    logits = jnp.transpose(logits_tm, (1, 0, 2))                # (B, T, V)

    expand = lambda a: a[None]                                  # match 1 x B x * layout
    return (logits,
            (expand(mu_pr), expand(mu_po)),
            (expand(logvar_pr), expand(logvar_po)),
            expand(alphas), bow)


# --------------------------------------------------------------------------- #
# Parameter construction (weights stored (in, out); biases stored (1, out))    #
# --------------------------------------------------------------------------- #
def init_params(key, vocab_size, num_topics, num_classes, embed_size,
                label_embed_size, hidden_size, code_size):
    keys = iter(jax.random.split(key, 64))

    def lin(in_dim, out_dim):
        s = 1.0 / jnp.sqrt(in_dim)
        w = jax.random.uniform(next(keys), (in_dim, out_dim), jnp.float32, -s, s)
        b = jax.random.uniform(next(keys), (1, out_dim), jnp.float32, -s, s)
        return w, b

    p = {}
    p["embed"] = 0.1 * jax.random.normal(next(keys), (vocab_size, embed_size), jnp.float32)
    p["label_embed"] = 0.1 * jax.random.normal(next(keys), (num_classes, label_embed_size), jnp.float32)
    # encoder / decoder LSTMs (gate order i,f,g,o; b = b_ih + b_hh fused)
    p["enc_wih"], _ = lin(embed_size, 4 * hidden_size)
    p["enc_whh"], p["enc_b"] = lin(hidden_size, 4 * hidden_size)
    p["dec_wih"], _ = lin(embed_size, 4 * hidden_size)
    p["dec_whh"], p["dec_b"] = lin(hidden_size, 4 * hidden_size)
    # fcout
    p["out_w"], p["out_b"] = lin(hidden_size, vocab_size)
    # ZPrior
    p["zp_w1"], p["zp_b1"] = lin(label_embed_size, hidden_size)
    p["zp_w2"], p["zp_b2"] = lin(hidden_size, 2 * code_size)
    # fcmu | fclogvar fused, input split [h | topics | lab_emb]
    p["po_w_h"], p["po_b"] = lin(hidden_size, 2 * code_size)
    p["po_w_t"], _ = lin(num_topics, 2 * code_size)
    p["po_w_l"], _ = lin(label_embed_size, 2 * code_size)
    # TopicPrior
    p["tp_w1_z"], p["tp_b1"] = lin(code_size, hidden_size)
    p["tp_w1_l"], _ = lin(label_embed_size, hidden_size)
    p["tp_w2"], p["tp_b2"] = lin(hidden_size, num_topics)
    # BowPredictor
    p["bow_w1_z"], p["bow_b1"] = lin(code_size, hidden_size)
    p["bow_w1_l"], _ = lin(label_embed_size, hidden_size)
    p["bow_w2"], p["bow_b2"] = lin(hidden_size, vocab_size)
    # decoder fccode
    p["dec_wc_z"], p["dec_bc"] = lin(code_size, 2 * hidden_size)
    p["dec_wc_t"], _ = lin(num_topics, 2 * hidden_size)
    p["dec_wc_l"], _ = lin(label_embed_size, 2 * hidden_size)
    return p


# --------------------------------------------------------------------------- #
# Pure-JAX reference                                                            #
# --------------------------------------------------------------------------- #
def _lstm_ref(x_tm, lens_col, h0, c0, wih, whh, b):
    seq_len = x_tm.shape[0]
    hidden = whh.shape[0]

    def step(carry, inp):
        h, c = carry
        x_t, t = inp
        gates = x_t @ wih + h @ whh + b
        i_g = _sigmoid(gates[:, :hidden])
        f_g = _sigmoid(gates[:, hidden:2 * hidden])
        g_g = jnp.tanh(gates[:, 2 * hidden:3 * hidden])
        o_g = _sigmoid(gates[:, 3 * hidden:])
        c_new = f_g * c + i_g * g_g
        h_new = o_g * jnp.tanh(c_new)
        valid = t < lens_col
        out_t = jnp.where(valid, h_new, 0.0)
        return (jnp.where(valid, h_new, h), jnp.where(valid, c_new, c)), out_t

    (h_f, _), outs = lax.scan(step, (h0, c0), (x_tm, jnp.arange(seq_len)))
    return h_f, outs


def textcvae_forward_ref(p, token_ids, labels, topics, lengths, eps):
    batch, _ = token_ids.shape
    code = p["po_w_h"].shape[1] // 2
    hidden = p["enc_whh"].shape[0]
    emb = jnp.take(p["embed"], token_ids, axis=0)
    lab = jnp.take(p["label_embed"], labels, axis=0)
    x_tm = jnp.transpose(emb, (1, 0, 2))
    lens_col = lengths.astype(jnp.int32).reshape(batch, 1)
    zeros = jnp.zeros((batch, hidden), jnp.float32)

    h_n, _ = _lstm_ref(x_tm, lens_col, zeros, zeros,
                       p["enc_wih"], p["enc_whh"], p["enc_b"])
    zpr = jnp.maximum(lab @ p["zp_w1"] + p["zp_b1"], 0.0) @ p["zp_w2"] + p["zp_b2"]
    mu_pr, logvar_pr = zpr[:, :code], zpr[:, code:]
    polv = h_n @ p["po_w_h"] + topics @ p["po_w_t"] + lab @ p["po_w_l"] + p["po_b"]
    mu_po, logvar_po = polv[:, :code], polv[:, code:]
    z = mu_po + jnp.exp(0.5 * logvar_po) * eps
    ht = jnp.maximum(z @ p["tp_w1_z"] + lab @ p["tp_w1_l"] + p["tp_b1"], 0.0)
    alphas = jnp.exp(ht @ p["tp_w2"] + p["tp_b2"])
    hb = jnp.maximum(z @ p["bow_w1_z"] + lab @ p["bow_w1_l"] + p["bow_b1"], 0.0)
    bow = hb @ p["bow_w2"] + p["bow_b2"]
    dechc = jnp.tanh(z @ p["dec_wc_z"] + topics @ p["dec_wc_t"]
                     + lab @ p["dec_wc_l"] + p["dec_bc"])
    dec_h0, dec_c0 = dechc[:, :hidden], dechc[:, hidden:]
    _, dec_out = _lstm_ref(x_tm, lens_col, dec_h0, dec_c0,
                           p["dec_wih"], p["dec_whh"], p["dec_b"])
    logits = jnp.transpose(dec_out @ p["out_w"] + p["out_b"], (1, 0, 2))
    return (logits, (mu_pr[None], mu_po[None]), (logvar_pr[None], logvar_po[None]),
            alphas[None], bow)


if __name__ == "__main__":
    vocab_size, num_topics, num_classes = 64, 16, 4
    embed_size, label_embed_size, hidden_size, code_size = 16, 8, 32, 16
    batch, seq_len = 2, 8

    key = jax.random.PRNGKey(0)
    kp, ktok, klab, ktop, keps = jax.random.split(key, 5)
    params = init_params(kp, vocab_size, num_topics, num_classes, embed_size,
                         label_embed_size, hidden_size, code_size)
    token_ids = jax.random.randint(ktok, (batch, seq_len), 0, vocab_size)
    labels = jax.random.randint(klab, (batch,), 0, num_classes)
    topics = jax.nn.softmax(
        jax.random.normal(ktop, (batch, num_topics), jnp.float32), axis=-1)
    lengths = jnp.array([seq_len, seq_len - 3], jnp.int32)
    eps = jax.random.normal(keps, (batch, code_size), jnp.float32)  # reparameterize path

    out = textcvae_forward(params, token_ids, labels, topics, lengths,
                           eps=eps, use_bf16=False)
    out = jax.block_until_ready(out)
    ref = textcvae_forward_ref(params, token_ids, labels, topics, lengths, eps)

    logits, (mu_pr, mu_po), (lv_pr, lv_po), alphas, bow = out
    r_logits, (r_mu_pr, r_mu_po), (r_lv_pr, r_lv_po), r_alphas, r_bow = ref

    assert logits.shape == (batch, seq_len, vocab_size)
    assert mu_pr.shape == (1, batch, code_size) and mu_po.shape == (1, batch, code_size)
    assert alphas.shape == (1, batch, num_topics)
    assert bow.shape == (batch, vocab_size)
    checks = [(logits, r_logits, "logits"), (mu_pr, r_mu_pr, "mu_pr"),
              (mu_po, r_mu_po, "mu_po"), (lv_pr, r_lv_pr, "logvar_pr"),
              (lv_po, r_lv_po, "logvar_po"), (alphas, r_alphas, "alphas"),
              (bow, r_bow, "bow")]
    for got, want, name in checks:
        assert jnp.allclose(got, want, rtol=2e-4, atol=2e-4), name

    # Exercise the bf16-MXU-input path only where the review recommends it.
    if _fast_bf16_supported():
        out_bf16 = jax.block_until_ready(
            textcvae_forward(params, token_ids, labels, topics, lengths,
                             eps=eps, use_bf16=True))
        assert all(bool(jnp.all(jnp.isfinite(x)))
                   for x in jax.tree_util.tree_leaves(out_bf16))

    print("KERNEL_OK")
</pallas_src>

<mosaic_0001>
module attributes {stable_mosaic.version = 11 : i64} {
  func.func @_encoder_lstm_kernel(%arg0: i32, %arg1: memref<8x2x16xf32, #tpu.memory_space<vmem>>, %arg2: memref<2x1xi32, #tpu.memory_space<vmem>>, %arg3: memref<16x128xf32, #tpu.memory_space<vmem>>, %arg4: memref<32x128xf32, #tpu.memory_space<vmem>>, %arg5: memref<1x128xf32, #tpu.memory_space<vmem>>, %arg6: memref<2x32xf32, #tpu.memory_space<vmem>>) attributes {dimension_semantics = [#tpu.dimension_semantics<parallel>], iteration_bounds = array<i64: 1>, scalar_prefetch = 0 : i64, scratch_operands = 0 : i64, tpu.core_type = #tpu.core_type<tc>, window_params = [{transform_indices = @transform_0, window_bounds = array<i64: 8, 2, 16>}, {transform_indices = @transform_1, window_bounds = array<i64: 2, 1>}, {pipeline_mode = #tpu.pipeline_mode<synchronous>, transform_indices = @transform_2, window_bounds = array<i64: 16, 128>}, {pipeline_mode = #tpu.pipeline_mode<synchronous>, transform_indices = @transform_3, window_bounds = array<i64: 32, 128>}, {pipeline_mode = #tpu.pipeline_mode<synchronous>, transform_indices = @transform_4, window_bounds = array<i64: 1, 128>}, {transform_indices = @transform_5, window_bounds = array<i64: 2, 32>}]} {
    %c0 = arith.constant 0 : index
    %c0_0 = arith.constant 0 : index
    %0 = vector.load %arg3[%c0, %c0_0] : memref<16x128xf32, #tpu.memory_space<vmem>>, vector<16x128xf32>
    %c0_1 = arith.constant 0 : index
    %c0_2 = arith.constant 0 : index
    %1 = vector.load %arg4[%c0_1, %c0_2] : memref<32x128xf32, #tpu.memory_space<vmem>>, vector<32x128xf32>
    %c0_3 = arith.constant 0 : index
    %c0_4 = arith.constant 0 : index
    %2 = vector.load %arg5[%c0_3, %c0_4] : memref<1x128xf32, #tpu.memory_space<vmem>>, vector<1x128xf32>
    %c0_5 = arith.constant 0 : index
    %c0_6 = arith.constant 0 : index
    %3 = vector.load %arg2[%c0_5, %c0_6] : memref<2x1xi32, #tpu.memory_space<vmem>>, vector<2x1xi32>
    %cst = arith.constant 0.000000e+00 : f32
    %4 = vector.broadcast %cst : f32 to vector<2x32xf32>
    %cst_7 = arith.constant 0.000000e+00 : f32
    %5 = vector.broadcast %cst_7 : f32 to vector<2x32xf32>
    %c0_i32 = arith.constant 0 : i32
    %c8_i32 = arith.constant 8 : i32
    %6 = arith.addi %c0_i32, %c8_i32 : i32
    %c1_i32 = arith.constant 1 : i32
    %7:2 = scf.for %arg7 = %c0_i32 to %6 step %c1_i32 iter_args(%arg8 = %4, %arg9 = %5) -> (vector<2x32xf32>, vector<2x32xf32>)  : i32 {
      %9 = arith.index_cast %arg7 : i32 to index
      %c0_11 = arith.constant 0 : index
      %c0_12 = arith.constant 0 : index
      %10 = vector.load %arg1[%9, %c0_11, %c0_12] : memref<8x2x16xf32, #tpu.memory_space<vmem>>, vector<1x2x16xf32>
      %11 = vector.shape_cast %10 : vector<1x2x16xf32> to vector<2x16xf32>
      %cst_13 = arith.constant dense<0.000000e+00> : vector<2x128xf32>
      %12 = tpu.matmul %11, %0, %cst_13 {dimension_numbers = #tpu.dot_dimension_numbers<[1], [0], [0], [1], [0, 0, 1, 1], [], []>, precision = #tpu.contract_precision<fp32>} : vector<2x16xf32>, vector<16x128xf32>, vector<2x128xf32> -> vector<2x128xf32>
      %cst_14 = arith.constant dense<0.000000e+00> : vector<2x128xf32>
      %13 = tpu.matmul %arg8, %1, %cst_14 {dimension_numbers = #tpu.dot_dimension_numbers<[1], [0], [0], [1], [0, 0, 1, 1], [], []>, precision = #tpu.contract_precision<fp32>} : vector<2x32xf32>, vector<32x128xf32>, vector<2x128xf32> -> vector<2x128xf32>
      %14 = arith.addf %12, %13 : vector<2x128xf32>
      %15 = vector.broadcast %2 : vector<1x128xf32> to vector<2x128xf32>
      %16 = arith.addf %14, %15 : vector<2x128xf32>
      %17 = vector.extract_strided_slice %16 {offsets = [0, 0], sizes = [2, 32], strides = [1, 1]} : vector<2x128xf32> to vector<2x32xf32>
      %cst_15 = arith.constant 0.000000e+00 : f32
      %18 = vector.broadcast %cst_15 : f32 to vector<2x32xf32>
      %19 = arith.subf %18, %17 : vector<2x32xf32>
      %20 = math.exp %19 : vector<2x32xf32>
      %cst_16 = arith.constant 1.000000e+00 : f32
      %21 = vector.broadcast %cst_16 : f32 to vector<2x32xf32>
      %22 = arith.addf %21, %20 : vector<2x32xf32>
      %cst_17 = arith.constant 1.000000e+00 : f32
      %23 = vector.broadcast %cst_17 : f32 to vector<2x32xf32>
      %24 = arith.divf %23, %22 : vector<2x32xf32>
      %25 = vector.extract_strided_slice %16 {offsets = [0, 32], sizes = [2, 32], strides = [1, 1]} : vector<2x128xf32> to vector<2x32xf32>
      %cst_18 = arith.constant 0.000000e+00 : f32
      %26 = vector.broadcast %cst_18 : f32 to vector<2x32xf32>
      %27 = arith.subf %26, %25 : vector<2x32xf32>
      %28 = math.exp %27 : vector<2x32xf32>
      %cst_19 = arith.constant 1.000000e+00 : f32
      %29 = vector.broadcast %cst_19 : f32 to vector<2x32xf32>
      %30 = arith.addf %29, %28 : vector<2x32xf32>
      %cst_20 = arith.constant 1.000000e+00 : f32
      %31 = vector.broadcast %cst_20 : f32 to vector<2x32xf32>
      %32 = arith.divf %31, %30 : vector<2x32xf32>
      %33 = vector.extract_strided_slice %16 {offsets = [0, 64], sizes = [2, 32], strides = [1, 1]} : vector<2x128xf32> to vector<2x32xf32>
      %34 = math.tanh %33 : vector<2x32xf32>
      %35 = vector.extract_strided_slice %16 {offsets = [0, 96], sizes = [2, 32], strides = [1, 1]} : vector<2x128xf32> to vector<2x32xf32>
      %cst_21 = arith.constant 0.000000e+00 : f32
      %36 = vector.broadcast %cst_21 : f32 to vector<2x32xf32>
      %37 = arith.subf %36, %35 : vector<2x32xf32>
      %38 = math.exp %37 : vector<2x32xf32>
      %cst_22 = arith.constant 1.000000e+00 : f32
      %39 = vector.broadcast %cst_22 : f32 to vector<2x32xf32>
      %40 = arith.addf %39, %38 : vector<2x32xf32>
      %cst_23 = arith.constant 1.000000e+00 : f32
      %41 = vector.broadcast %cst_23 : f32 to vector<2x32xf32>
      %42 = arith.divf %41, %40 : vector<2x32xf32>
      %43 = arith.mulf %32, %arg9 : vector<2x32xf32>
      %44 = arith.mulf %24, %34 : vector<2x32xf32>
      %45 = arith.addf %43, %44 : vector<2x32xf32>
      %46 = math.tanh %45 : vector<2x32xf32>
      %47 = arith.mulf %42, %46 : vector<2x32xf32>
      %48 = vector.broadcast %arg7 : i32 to vector<2x1xi32>
      %49 = arith.cmpi slt, %48, %3 : vector<2x1xi32>
      %50 = vector.shape_cast %49 : vector<2x1xi1> to vector<2x1xi1>
      %51 = vector.broadcast %50 : vector<2x1xi1> to vector<2x32xi1>
      %52 = arith.select %51, %47, %arg8 : vector<2x32xi1>, vector<2x32xf32>
      %53 = vector.shape_cast %49 : vector<2x1xi1> to vector<2x1xi1>
      %54 = vector.broadcast %53 : vector<2x1xi1> to vector<2x32xi1>
      %55 = arith.select %54, %45, %arg9 : vector<2x32xi1>, vector<2x32xf32>
      scf.yield %52, %55 : vector<2x32xf32>, vector<2x32xf32>
    }
    %c8_i32_8 = arith.constant 8 : i32
    %c0_9 = arith.constant 0 : index
    %c0_10 = arith.constant 0 : index
    %8 = vector.load %arg6[%c0_9, %c0_10] : memref<2x32xf32, #tpu.memory_space<vmem>>, vector<2x32xf32>
    tpu.vector_store %arg6[%c0_9, %c0_10], %7#0 {strides = array<i32>} : memref<2x32xf32, #tpu.memory_space<vmem>>, vector<2x32xf32>,
    return
  }
  func.func @transform_0(%arg0: i32) -> (i32, i32, i32) {
    %c0_i32 = arith.constant 0 : i32
    %c0_i32_0 = arith.constant 0 : i32
    %c0_i32_1 = arith.constant 0 : i32
    return %c0_i32, %arg0, %c0_i32_0 : i32, i32, i32
  }
  func.func @transform_1(%arg0: i32) -> (i32, i32) {
    %c0_i32 = arith.constant 0 : i32
    %c0_i32_0 = arith.constant 0 : i32
    return %arg0, %c0_i32 : i32, i32
  }
  func.func @transform_2(%arg0: i32) -> (i32, i32) {
    %c0_i32 = arith.constant 0 : i32
    %c0_i32_0 = arith.constant 0 : i32
    %c0_i32_1 = arith.constant 0 : i32
    return %c0_i32, %c0_i32_0 : i32, i32
  }
  func.func @transform_3(%arg0: i32) -> (i32, i32) {
    %c0_i32 = arith.constant 0 : i32
    %c0_i32_0 = arith.constant 0 : i32
    %c0_i32_1 = arith.constant 0 : i32
    return %c0_i32, %c0_i32_0 : i32, i32
  }
  func.func @transform_4(%arg0: i32) -> (i32, i32) {
    %c0_i32 = arith.constant 0 : i32
    %c0_i32_0 = arith.constant 0 : i32
    %c0_i32_1 = arith.constant 0 : i32
    return %c0_i32, %c0_i32_0 : i32, i32
  }
  func.func @transform_5(%arg0: i32) -> (i32, i32) {
    %c0_i32 = arith.constant 0 : i32
    %c0_i32_0 = arith.constant 0 : i32
    return %arg0, %c0_i32 : i32, i32
  }
}

</mosaic_0001>

<bundles_post_ra>
// kernel: tpu_custom_call.1
= control target key start
LH: loop header
LB: loop body
LE: loop exit
PB: predicated region body
PF: predicated region fallthrough
CT: control target
= control target key end

     0   :  { %10 = vsyncpa [#allocation3], 0  ;;  %s1727_s0 = inlined_call_operand.hbm [shape: f32[8,2,16], index: 0, kind: input, shape index: {}]   ;;  %s1728_s1 = inlined_call_operand.vmem [shape: s32[2,1], index: 1, kind: input, shape index: {}]   ;;  %s1729_s2 = inlined_call_operand.hbm [shape: f32[16,128], index: 2, kind: input, shape index: {}]   ;;  %s1730_s3 = inlined_call_operand.hbm [shape: f32[32,128], index: 3, kind: input, shape index: {}]   ;;  %s1731_s4 = inlined_call_operand.vmem [shape: f32[1,128], index: 4, kind: input, shape index: {}]   ;;  %s1732_s5 = inlined_call_operand.hbm [shape: f32[2,32], index: 5, kind: output, shape index: {}]  }
   0x1   :  { %11 = vsyncpa [#allocation6], 0 }
   0x2   :  { %12 = vsyncpa [#allocation4], 0  ;;  %s1488_s18 = smov [#allocation5]   ;;  %s1370_s22 = scalar_lea.hbm %s1729_s2, 256 }
   0x3   :  { %s32_s19 = sshll.u32 %s1488_s18, 4  ;;  %p1371_p0 = scmp.ne.s32.totalorder %s1729_s2, %s1370_s22  ;;  %s33_s19 = int_to_ptr.vmem [resolvable:$true] %s32_s19 }
   0x4   :  { %p1374_p1 = scmp.lt.u32.totalorder %s1370_s22, %s1729_s2 }
   0x6   :  { %p1376_p2 = pnand %p1374_p1, %p1371_p0 }
   0x8   :  { %1379 = shalt.err (!%p1376_p2)
}
   0x9   :  { %s1380_s27 = scalar_lea.vmem %s33_s19, 256  ;;  %p1385_p4 = scmp.lt.s32.totalorder %s33_s19, %s33_s19 }
   0xa   :  { %p1381_p3 = scmp.ne.s32.totalorder %s33_s19, %s1380_s27  ;;  %p1386_p5 = scmp.lt.s32.totalorder %s1380_s27, %s1380_s27 }
   0xc   :  { %p1387_p6 = por %p1386_p5, %p1385_p4 }
   0xe   :  { %p1388_p7 = pnand %p1387_p6, %p1381_p3 }
  0x10   :  { %1391 = shalt.err (!%p1388_p7)
}
  0x11   :  { %s1489_s28 = smov 128   ;;  %s1490_s29 = smov 8  }
  0x12   :  { %38 = dma.hbm_to_vmem [thread:$0]  %s1729_s2, 256, %s33_s19, [#allocation6], %s1489_s28, %s1489_s28, %s1490_s29  }
  0x13   :  { %s1491_s7 = smov [#allocation2]   ;;  %s1392_s11 = scalar_lea.hbm %s1727_s0, 256 }
  0x14   :  { %s18_s8 = sshll.u32 %s1491_s7, 4  ;;  %p1393_p8 = scmp.ne.s32.totalorder %s1727_s0, %s1392_s11  ;;  %s19_s8 = int_to_ptr.vmem [resolvable:$true] %s18_s8 }
  0x15   :  { %p1396_p9 = scmp.lt.u32.totalorder %s1392_s11, %s1727_s0 }
  0x17   :  { %p1398_p10 = pnand %p1396_p9, %p1393_p8 }
  0x19   :  { %1401 = shalt.err (!%p1398_p10)
}
  0x1a   :  { %s1402_s16 = scalar_lea.vmem %s19_s8, 256  ;;  %p1407_p12 = scmp.lt.s32.totalorder %s19_s8, %s19_s8 }
  0x1b   :  { %p1403_p11 = scmp.ne.s32.totalorder %s19_s8, %s1402_s16  ;;  %p1408_p13 = scmp.lt.s32.totalorder %s1402_s16, %s1402_s16 }
  0x1d   :  { %p1409_p0 = por %p1408_p13, %p1407_p12 }
  0x1f   :  { %p1410_p1 = pnand %p1409_p0, %p1403_p11 }
  0x21   :  { %1413 = shalt.err (!%p1410_p1)
}
  0x22   :  { %s1492_s2 = smov 32   ;;  %s1493_s17 = smov 2  }
  0x23   :  { %24 = dma.hbm_to_vmem [thread:$0]  %s1727_s0, 256, %s19_s8, [#allocation3], %s1492_s2, %s1492_s2, %s1493_s17  }
  0x24   :  { %s1494_s20 = smov [#allocation7]   ;;  %s1414_s24 = scalar_lea.hbm %s1730_s3, 512 }
  0x25   :  { %s44_s21 = sshll.u32 %s1494_s20, 4  ;;  %p1415_p2 = scmp.ne.s32.totalorder %s1730_s3, %s1414_s24  ;;  %s45_s21 = int_to_ptr.vmem [resolvable:$true] %s44_s21 }
  0x26   :  { %p1418_p3 = scmp.lt.u32.totalorder %s1414_s24, %s1730_s3 }
  0x28   :  { %p1420_p4 = pnand %p1418_p3, %p1415_p2 }
  0x2a   :  { %1423 = shalt.err (!%p1420_p4)
}
  0x2b   :  { %s1424_s6 = scalar_lea.vmem %s45_s21, 512  ;;  %p1429_p6 = scmp.lt.s32.totalorder %s45_s21, %s45_s21 }
  0x2c   :  { %p1425_p5 = scmp.ne.s32.totalorder %s45_s21, %s1424_s6  ;;  %p1430_p7 = scmp.lt.s32.totalorder %s1424_s6, %s1424_s6 }
  0x2e   :  { %p1431_p8 = por %p1430_p7, %p1429_p6 }
  0x30   :  { %p1432_p9 = pnand %p1431_p8, %p1425_p5 }
  0x32   :  { %1435 = shalt.err (!%p1432_p9)
}
  0x33   :  { %50 = dma.hbm_to_vmem [thread:$0]  %s1730_s3, 512, %s45_s21, [#allocation6], %s1489_s28, %s1489_s28, %s1490_s29  }
  0x34   :  { %1470 = dma.done.wait [#allocation3], 256  }
  0x35   :  { %1471 = vsyncadd [#allocation3], 4294967040 }
  0x36   :  { %1472 = dma.done.wait [#allocation6], 768  }
  0x37   :  { %1473 = vsyncadd [#allocation6], 4294966528  ;;  %v1576_v0 = vld [vmem:[#allocation5] sm:$0xff]  ;;  %v1578_v1 = vld [vmem:[#allocation5 + $0x8] sm:$0xff]  ;;  %v1598_v8 = vmov 0.0   ;;  %v1600_v9 = vmov 0.0  }
  0x38   :  { %v1580_v2 = vld [vmem:[#allocation7] sm:$0xff]  ;;  %v1582_v3 = vld [vmem:[#allocation7 + $0x8] sm:$0xff]  ;;  %v1584_v4 = vld [vmem:[#allocation7 + $0x10] sm:$0xff]  ;;  %s1602_s29 = smov 0  }
  0x39   :  { %v1586_v5 = vld [vmem:[#allocation7 + $0x18] sm:$0xff]  ;;  %v1591_v6 = vld [vmem:[%s1731_s4] ss:$0 sm:$0xff] }
  0x3a   :  { %v1596_v7 = vld [vmem:[%s1728_s1] sm:$0x3] }
  0x3b LB: > { %v88_v10 = vand.u32 4294901760, %v1580_v2  ;;  %v91_v11 = vand.u32 4294901760, %v1582_v3  ;;  %v1495_v12 = vmov 0.0|0.0   ;;  %v94_v13 = vand.u32 4294901760, %v1584_v4  ;;  %s1496_s1 = smov 32   ;;  %s1110_s4 = sshll.u32 %s1486_s29, 1  ;;  %s1486_s29 = sphi %s1602_s29, %s75_s29   ;;  %v1482_v9 = vphi %v1600_v9, %v1733_v9   ;;  %v1478_v8 = vphi %v1598_v8, %v1074_v8  }
  0x3c   : > { %1274 = vmatprep.subr.bf16.mxu1 %v1495_v12  ;;  %v97_v14 = vand.u32 4294901760, %v1586_v5  ;;  %1268 = vmatprep.subr.bf16.mxu0 %v1495_v12  ;;  %vm1497_vm0 = vmmov 0   ;;  %v1498_v19 = vmov 0.0   ;;  %vm84_vm1 = vcmask 261120   ;;  %s79_s10 = scalar_lea.vmem [#allocation2], %s1110_s4  ;;  %s1500_s11 = smov 64  }
  0x3d   : > { %82 = vrot.lane.b32.xlu0 %v1482_v9, %s1496_s1  ;;  %v1622_v15 = vsub.f32 %v1580_v2, %v88_v10  ;;  %v1625_v16 = vsub.f32 %v1582_v3, %v91_v11  ;;  %v1628_v17 = vsub.f32 %v1584_v4, %v94_v13  ;;  %1179 = vmatprep.mubr.msk.f32.mxu1 %vm1497_vm0, %v1498_v19  ;;  %v577_v40 = vand.u32 4294901760, %v1576_v0  ;;  %v80_v51 = vld [vmem:[%s79_s10] sm:$0x3] }
  0x3e   : > { %v1631_v18 = vsub.f32 %v1586_v5, %v97_v14  ;;  %v1269_v20 = vpack.c.bf16 %v91_v11, %v88_v10  ;;  %1168 = vmatprep.mubr.msk.f32.mxu0 %vm1497_vm0, %v1498_v19  ;;  %v1272_v26 = vpack.c.bf16 %v97_v14, %v94_v13  ;;  %v580_v41 = vand.u32 4294901760, %v1578_v1 }
  0x3f   : > { %v169_v21 = vand.u32 4294901760, %v1622_v15  ;;  %v176_v22 = vand.u32 4294901760, %v1625_v16  ;;  %v1281_v23 = vpack.c.bf16 %v1625_v16, %v1622_v15  ;;  %v183_v24 = vand.u32 4294901760, %v1628_v17 }
  0x40   : > { %v190_v25 = vand.u32 4294901760, %v1631_v18  ;;  %1270 = vmatpush3.bf16.msra.mxu0 %v1269_v20  ;;  %v1284_v27 = vpack.c.bf16 %v1631_v18, %v1628_v17  ;;  %v1657_v45 = vsub.f32 %v1576_v0, %v577_v40  ;;  %v1660_v46 = vsub.f32 %v1578_v1, %v580_v41 }
  0x41   : > { %v170_v28 = vsub.f32 %v1622_v15, %v169_v21  ;;  %v177_v29 = vsub.f32 %v1625_v16, %v176_v22  ;;  %1271 = vmatprep.subr.bf16.mxu0 %v1495_v12  ;;  %v184_v30 = vsub.f32 %v1628_v17, %v183_v24  ;;  %v1293_v32 = vpack.c.bf16 %v176_v22, %v169_v21 }
  0x42   : > { %v191_v31 = vsub.f32 %v1631_v18, %v190_v25  ;;  %v1296_v38 = vpack.c.bf16 %v190_v25, %v183_v24  ;;  %v656_v49 = vand.u32 4294901760, %v1657_v45  ;;  %v663_v50 = vand.u32 4294901760, %v1660_v46 }
  0x43   : > { %v171_v33 = vand.u32 4294901760, %v170_v28  ;;  %v178_v34 = vand.u32 4294901760, %v177_v29  ;;  %v185_v35 = vand.u32 4294901760, %v184_v30  ;;  %vm572_vm2 = vcmask 130048  }
  0x44   : > { %v192_v36 = vand.u32 4294901760, %v191_v31  ;;  %1273 = vmatpush3.bf16.msra.mxu0 %v1272_v26  ;;  %v574_v53 = vsel %vm572_vm2, %v80_v51, 0  ;;  %v657_v55 = vsub.f32 %v1657_v45, %v656_v49  ;;  %v664_v56 = vsub.f32 %v1660_v46, %v663_v50 }
  0x45   : > { %v1275_v37 = vpack.c.bf16 %v178_v34, %v171_v33  ;;  %1280 = vmatprep.subr.bf16.mxu0 %v1495_v12  ;;  %v643_v57 = vand.u32 4294901760, %v574_v53  ;;  %v1305_v63 = vpack.c.bf16 %v580_v41, %v577_v40  ;;  %v1311_v13 = vpack.c.bf16 %v1660_v46, %v1657_v45 }
  0x46   : > { %v1278_v39 = vpack.c.bf16 %v192_v36, %v185_v35  ;;  %v658_v58 = vand.u32 4294901760, %v657_v55  ;;  %v665_v59 = vand.u32 4294901760, %v664_v56  ;;  %v1317_v14 = vpack.c.bf16 %v663_v50, %v656_v49 }
  0x47   : > { %1276 = vmatpush3.bf16.msra.mxu1 %v1275_v37  ;;  %v644_v60 = vsub.f32 %v574_v53, %v643_v57  ;;  %v1499_v50 = vmov 0   ;;  %v1066_v56 = vstv %s1486_s29  ;;  %s75_s29 = sadd.s32 1, %s1486_s29  }
  0x48   : > { %1277 = vmatprep.subr.bf16.mxu1 %v1495_v12  ;;  %v1308_v61 = vpack.c.bf16 %v665_v59, %v658_v58  ;;  %1360 = vset.pattern.permute.xlu1 %v1499_v50  ;;  %vm1067_vm3 = vcmp.lt.s32.totalorder %v1066_v56, %v1596_v7  ;;  %p72_p10 = scmp.ge.s32.totalorder %s75_s29, 8  }
  0x49   : > { %v645_v62 = vand.u32 4294901760, %v644_v60  ;;  %1361 = vset.pattern.permute.xlu0 %v1499_v50  ;;  %s1501_s12 = smov (%p72_p10), [#allocation8]   ;;  %vm1079_vm5 = vcmask (%p72_p10), 254976  }
  0x4a   :  { %s1087_s13 = sshll.u32 (%p72_p10), %s1501_s12, 4  ;;  %s1088_s13 = int_to_ptr.vmem [resolvable:$true] %s1087_s13 }
  0x4b   : > { %1279 = vmatpush3.bf16.msra.mxu1 %v1278_v39  ;;  %v646_v10 = vsub.f32 %v644_v60, %v645_v62  ;;  %s1436_s14 = scalar_lea.vmem (%p72_p10), %s1088_s13, 32  ;;  %p1441_p12 = scmp.lt.s32.totalorder (%p72_p10), %s1088_s13, %s1088_s13 }
  0x4c   : > { %1286 = vmatprep.subr.bf16.mxu1 %v1495_v12  ;;  %p1437_p11 = scmp.ne.s32.totalorder (%p72_p10), %s1088_s13, %s1436_s14  ;;  %p1442_p13 = scmp.lt.s32.totalorder (%p72_p10), %s1436_s14, %s1436_s14 }
  0x4d   : > { %v647_v11 = vand.u32 4294901760, %v646_v10 }
  0x4e   :  { %p1443_p0 = por (%p72_p10), %p1442_p13, %p1441_p12 }
  0x50   :  { %p1444_p1 = pnand (%p72_p10), %p1443_p0, %p1437_p11 }
  0xaf   : > { %v83_v42 = vpop.permute.xlu0 %82 }
  0xb0   : > { %v85_v43 = vsel %vm84_vm1, %v83_v42, 0 }
  0xb1   : > { %v156_v44 = vand.u32 4294901760, %v85_v43 }
  0xb3   : > { %v157_v47 = vsub.f32 %v85_v43, %v156_v44  ;;  %1180 = vmatmul.mubr.f32.vlgmr.msra.gmra.mrb[0].mxu1 %v156_v44 }
  0xb4   : > { %1288 = vmatpush3.bf16.msra.mxu1 %v1269_v20  ;;  %1201 = vmatprep.mubr.msk.f32.mxu1 %vm1497_vm0, %v1498_v19 }
  0xb5   : > { %v158_v48 = vand.u32 4294901760, %v157_v47  ;;  %1289 = vmatprep.subr.bf16.mxu1 %v1495_v12 }
  0xb7   : > { %v159_v52 = vsub.f32 %v157_v47, %v158_v48 }
  0xb8   : > { %1291 = vmatpush3.bf16.msra.mxu1 %v1272_v26 }
  0xb9   : > { %1298 = vmatprep.subr.bf16.mxu1 %v1495_v12  ;;  %v160_v54 = vand.u32 4294901760, %v159_v52 }
  0xbb   : > { %1202 = vmatmul.mubr.f32.vlgmr.msra.gmra.mrb[2].mxu1 %v158_v48  ;;  %1169 = vmatmul.mubr.f32.vlgmr.msra.gmra.mrb[0].mxu0 %v160_v54 }
  0xbc   : > { %1282 = vmatpush3.bf16.msra.mxu0 %v1281_v23  ;;  %1300 = vmatpush3.bf16.msra.mxu1 %v1269_v20 }
  0xbd   : > { %1283 = vmatprep.subr.bf16.mxu0 %v1495_v12  ;;  %1301 = vmatprep.subr.bf16.mxu1 %v1495_v12 }
  0xbe   : > { %1190 = vmatprep.mubr.msk.f32.mxu0 %vm1497_vm0, %v1498_v19  ;;  %1223 = vmatprep.mubr.msk.f32.mxu1 %vm1497_vm0, %v1498_v19 }
  0xc0   : > { %1285 = vmatpush3.bf16.msra.mxu0 %v1284_v27  ;;  %1303 = vmatpush3.bf16.msra.mxu1 %v1272_v26 }
  0xc1   : > { %1292 = vmatprep.subr.bf16.mxu0 %v1495_v12  ;;  %1307 = vmatprep.subr.bf16.mxu1 %v1495_v12 }
  0xc3   : > { %1191 = vmatmul.mubr.f32.vlgmr.msra.gmra.mrb[2].mxu0 %v157_v47  ;;  %1224 = vmatmul.mubr.f32.vlgmr.msra.gmra.mrb[4].mxu1 %v156_v44 }
  0xc4   : > { %1294 = vmatpush3.bf16.msra.mxu0 %v1293_v32  ;;  %1212 = vmatprep.mubr.msk.f32.mxu0 %vm1497_vm0, %v1498_v19 }
  0xc5   : > { %1295 = vmatprep.subr.bf16.mxu0 %v1495_v12  ;;  %1309 = vmatpush3.bf16.msra.mxu1 %v1308_v61 }
  0xc6   : > { %1237 = vmatprep.mubr.msk.f32.mxu1 %vm1497_vm0, %v1498_v19  ;;  %1313 = vmatprep.subr.bf16.mxu1 %v1495_v12 }
  0xc8   : > { %1297 = vmatpush3.bf16.msra.mxu0 %v1296_v38  ;;  %1238 = vmatmul.mubr.f32.vlgmr.msra.gmra.mrb[6].mxu1 %v643_v57 }
  0xc9   : > { %1304 = vmatprep.subr.bf16.mxu0 %v1495_v12  ;;  %1315 = vmatpush3.bf16.msra.mxu1 %v1305_v63 }
  0xca   : > { %1251 = vmatprep.mubr.msk.f32.mxu1 %vm1497_vm0, %v1498_v19  ;;  %1319 = vmatprep.subr.bf16.mxu1 %v1495_v12 }
  0xcb   : > { %1213 = vmatmul.mubr.f32.vlgmr.msra.gmra.mrb[4].mxu0 %v156_v44 }
  0xcc   : > { %1306 = vmatpush3.bf16.msra.mxu0 %v1305_v63  ;;  %1230 = vmatprep.mubr.msk.f32.mxu0 %vm1497_vm0, %v1498_v19 }
  0xcd   : > { %1310 = vmatprep.subr.bf16.mxu0 %v1495_v12  ;;  %1252 = vmatmul.mubr.f32.vlgmr.msra.gmra.mrb[8].mxu1 %v645_v62 }
  0xce   : > { %1321 = vmatpush3.bf16.msra.mxu1 %v1305_v63  ;;  %1265 = vmatprep.mubr.msk.f32.mxu1 %vm1497_vm0, %v1498_v19 }
  0xcf   : > { %1231 = vmatmul.mubr.f32.vlgmr.msra.gmra.mrb[6].mxu0 %v647_v11 }
  0xd0   : > { %1312 = vmatpush3.bf16.msra.mxu0 %v1311_v13  ;;  %1244 = vmatprep.mubr.msk.f32.mxu0 %vm1497_vm0, %v1498_v19 }
  0xd1   : > { %1316 = vmatprep.subr.bf16.mxu0 %v1495_v12  ;;  %1266 = vmatmul.mubr.f32.vlgmr.msra.gmra.mrb[10].mxu1 %v643_v57 }
  0xd3   : > { %1245 = vmatmul.mubr.f32.vlgmr.msra.gmra.mrb[8].mxu0 %v644_v60  ;;  %v1068_v60 = vsel %vm1067_vm3, 1, %v1499_v50 }
  0xd4   : > { %1318 = vmatpush3.bf16.msra.mxu0 %v1317_v14  ;;  %1258 = vmatprep.mubr.msk.f32.mxu0 %vm1497_vm0, %v1498_v19 }
  0xd7   : > { %1259 = vmatmul.mubr.f32.vlgmr.msra.gmra.mrb[10].mxu0 %v643_v57 }
 0x186   : > { %v253_v15 = vpop.f32.mrb[0].mxu1 }
 0x187   : > { %v1181_v16 = vpop.f32.mrb[1].mxu1 }
 0x18e   : > { %v410_v17 = vpop.f32.mrb[2].mxu1  ;;  %v162_v18 = vpop.f32.mrb[0].mxu0 }
 0x18f   : > { %v254_v20 = vadd.f32 %v253_v15, %v162_v18  ;;  %v1203_v21 = vpop.f32.mrb[3].mxu1  ;;  %v1170_v22 = vpop.f32.mrb[1].mxu0 }
 0x196   : > { %v333_v23 = vpop.f32.mrb[2].mxu0  ;;  %v568_v24 = vpop.f32.mrb[4].mxu1 }
 0x197   : > { %v334_v25 = vadd.f32 %v333_v23, %v254_v20  ;;  %v1192_v26 = vpop.f32.mrb[3].mxu0  ;;  %v1225_v27 = vpop.f32.mrb[5].mxu1 }
 0x199   : > { %v411_v12 = vadd.f32 %v410_v17, %v334_v25 }
 0x19b   : > { %v730_v28 = vpop.f32.mrb[6].mxu1 }
 0x19c   : > { %v1239_v29 = vpop.f32.mrb[7].mxu1 }
 0x19e   : > { %v493_v30 = vpop.f32.mrb[4].mxu0 }
 0x19f   : > { %v494_v31 = vadd.f32 %v493_v30, %v411_v12  ;;  %v1214_v32 = vpop.f32.mrb[5].mxu0 }
 0x1a0   : > { %v881_v19 = vpop.f32.mrb[8].mxu1 }
 0x1a1   : > { %v569_v33 = vadd.f32 %v568_v24, %v494_v31  ;;  %v1253_v34 = vpop.f32.mrb[9].mxu1 }
 0x1a2   : > { %v649_v35 = vpop.f32.mrb[6].mxu0 }
 0x1a3   : > { %v650_v36 = vadd.f32 %v649_v35, %v569_v33  ;;  %v1232_v37 = vpop.f32.mrb[7].mxu0 }
 0x1a4   : > { %v1031_v38 = vpop.f32.mrb[10].mxu1 }
 0x1a5   : > { %v731_v39 = vadd.f32 %v730_v28, %v650_v36  ;;  %v1267_v40 = vpop.f32.mrb[11].mxu1 }
 0x1a6   : > { %v806_v41 = vpop.f32.mrb[8].mxu0 }
 0x1a7   : > { %v807_v42 = vadd.f32 %v806_v41, %v731_v39  ;;  %v1246_v43 = vpop.f32.mrb[9].mxu0 }
 0x1a9   : > { %v882_v44 = vadd.f32 %v881_v19, %v807_v42 }
 0x1aa   : > { %v958_v45 = vpop.f32.mrb[10].mxu0 }
 0x1ab   : > { %v959_v46 = vadd.f32 %v958_v45, %v882_v44  ;;  %v1260_v47 = vpop.f32.mrb[11].mxu0 }
 0x1ad   : > { %v1032_v48 = vadd.f32 %v1031_v38, %v959_v46 }
 0x1af   : > { %v1041_v49 = vadd.f32 %v1591_v6, %v1032_v48 }
 0x1b1   : > { %1362 = vtanh.f32 %v1041_v49  ;;  %v1042_v52 = vsub.f32 0.0, %v1041_v49 }
 0x1b3   : > { %v1043_v53 = vmul.f32 1.442695, %v1042_v52 }
 0x1b5   : > { %1364 = vpow2.f32 %v1043_v53 }
 0x1bb   : > { %v1363_v51 = vpop.eup %1362 }
 0x1bc   : > { %1051 = vrot.lane.b32.xlu0 %v1363_v51, %s1500_s11 }
 0x1bf   : > { %v1365_v54 = vpop.eup %1364 }
 0x1c0   : > { %v1045_v55 = vadd.f32 1.0, %v1365_v54 }
 0x1c2   : > { %1366 = vrcp.f32 %v1045_v55 }
 0x1cc   : > { %v1367_v57 = vpop.eup %1366 }
 0x1cd   : > { %v1049_v61 = vmul.f32 %v1478_v8, %v1367_v57 }
 0x22e   : > { %v1052_v58 = vpop.permute.xlu0 %1051 }
 0x22f   : > { %v1054_v59 = vmul.f32 %v1367_v57, %v1052_v58 }
 0x231   : > { %1056 = vrot.lane.b32.xlu1 %v1054_v59, %s1496_s1 }
 0x235   : > { %1070 = vperm.xlu1 %1360, %v1068_v60  }
 0x2a3   : > { %v1057_v62 = vpop.permute.xlu1 %1056 }
 0x2a4   : > { %v1059_v63 = vadd.f32 %v1057_v62, %v1049_v61 }
 0x2a6   : > { %1368 = vtanh.f32 %v1059_v63 }
 0x2b0   : > { %v1369_v10 = vpop.eup %1368 }
 0x2b1   : > { %1062 = vrot.lane.b32.xlu0 %v1369_v10, %s1500_s11 }
 0x2b4   : > { %v1071_v11 = vpop.permute.xlu1 %1070 }
 0x2b5   : > { %vm1072_vm4 = vcmp.eq.s32.totalorder %v1071_v11, 1 }
 0x2b6   : > { %v1074_v8 = vsel %vm1072_vm4, %v1059_v63, %v1478_v8  }
 0x321   :  { %74 = sbr.rel (!%p72_p10) target bundleno = 59 (0x3b), region = 60 }
 0x323   : > { %v1063_v13 = vpop.permute.xlu0 %1062 }
 0x324   : > { %v1065_v14 = vmul.f32 %v1367_v57, %v1063_v13 }
 0x326   : > { %v1073_v15 = vsel %vm1072_vm4, %v1065_v14, %v1482_v9  }
 0x327   : > { %v1733_v9 = vmov %v1073_v15  ;;  %1076 = vrot.lane.b32.xlu0 (%p72_p10), %v1073_v15, %s1492_s2 }
 0x399   :  { %v1077_v16 = vpop.permute.xlu0 %1076 }
 0x39a   :  { %1080 = vst.msk [vmem:[#allocation8] sm:$0x3] %vm1079_vm5, %v1077_v16 }
 0x39b   :  { %1447 = shalt.err (!%p1444_p1)
}
 0x39c   :  { %s1448_s17 = scalar_lea.hbm %s1732_s5, 32 }
 0x39d   :  { %p1449_p2 = scmp.ne.s32.totalorder %s1732_s5, %s1448_s17  ;;  %p1452_p3 = scmp.lt.u32.totalorder %s1448_s17, %s1732_s5 }
 0x39f   :  { %p1454_p4 = pnand %p1452_p3, %p1449_p2 }
 0x3a1   :  { %1457 = shalt.err (!%p1454_p4)
}
 0x3a2   :  { %1090 = dma.vmem_to_hbm [thread:$0]  %s1088_s13, 32, %s1732_s5, [#allocation4]  }
 0x3a3   :  { %1474 = dma.done.wait [#allocation4], 32  }
 0x3a4   :  { %1475 = vsyncadd [#allocation4], 4294967264 }
 0x3a5   :  { %1094 = vsyncpa [#allocation3], 1 }
 0x3a6   :  { %1095 = vsyncpa [#allocation6], 1 }
 0x3a7   :  { %1096 = vsyncpa [#allocation4], 1 }

</bundles_post_ra>
